<compile_context>
chip_gen: v7x
topology: tpu7x:2x2x1
jax: 0.10.0
libtpu: 0.0.40
codegen_flags: <defaults>
</compile_context>

<pallas_src>
import functools

import jax
import jax.numpy as jnp
import numpy as np
from jax.experimental import pallas as pl
from jax.experimental.pallas import tpu as pltpu

PMIN_COND = 1e-10
PMAX = 1.0          # == 1.0, so the sigmoid scale multiply is elided in-kernel
LANES = 128         # lane width of the padded MLP output


def _round_up(x, n):
    return ((x + n - 1) // n) * n


def _fwd_kernel(tile_b, users_pad, users, batch, nt,
                hx_ref, w1_ref, b1_ref, w2_ref, b2_ref,
                pt_ref, part_ref):
    hx = hx_ref[...]                                             # (tile_b, feat)

    # ---- self.model(**Hx_dir): synthetic power-allocation MLP (MXU) --------
    h1 = jnp.maximum(
        jnp.dot(hx, w1_ref[...], preferred_element_type=jnp.float32)
        + b1_ref[...], 0.0)
    logits = (jnp.dot(h1, w2_ref[...], preferred_element_type=jnp.float32)
              + b2_ref[...])                                     # (tile_b, 128)
    # sigmoid via tanh: one EUP op, no exact f32 divide (PMAX == 1.0).
    pt = 0.5 * jnp.tanh(0.5 * logits) + 0.5

    mask = (pt > PMIN_COND).astype(jnp.float32)
    gated = pt * mask                                            # pt*(pt>PMIN_COND)

    # pt writeback, user-major (users_pad, tile_b): lane-dense on the batch
    # axis and 16x fewer bytes than a (tile_b, 128) slab.  The aligned
    # (tile_b, 128) transpose runs on the otherwise idle XLU.
    pt_ref[...] = jnp.transpose(gated)[:users_pad, :]

    # rate / energy partials at user width; Hx[:, :users] is just the first
    # lanes of the hx tile (no separate hch input).
    pt_u = pt[:, :users_pad]
    gated_u = gated[:, :users_pad]
    mask_u = mask[:, :users_pad]
    hch = hx[:, :users_pad]
    if users != users_pad:
        lane = jax.lax.broadcasted_iota(jnp.int32, (1, users_pad), 1)
        hch = hch * (lane < users).astype(jnp.float32)

    f_q = jnp.log(1.0 + pt_u * hch)            # rate utility; m applied in epilogue

    # direct sublane-row stores into the per-tile partial slab (rows 3..7 unused)
    part_ref[0:1, :] = jnp.sum(f_q, axis=0, keepdims=True)       # sum f_q
    part_ref[1:2, :] = jnp.sum(gated_u, axis=0, keepdims=True)   # sum pt*mask (* -1/B later)
    part_ref[2:3, :] = jnp.sum(mask_u, axis=0, keepdims=True)    # mask count

    if batch % tile_b != 0:
        # Only the final tile carries zero-padded rows.  f_q already sums to 0
        # there (hch == 0); re-accumulate the energy/count rows with a row mask.
        @pl.when(pl.program_id(0) == nt - 1)
        def _():
            valid = batch - (nt - 1) * tile_b
            rows = jax.lax.broadcasted_iota(jnp.int32, (tile_b, 1), 0)
            rv = (rows < valid).astype(jnp.float32)
            part_ref[1:2, :] = jnp.sum(gated_u * rv, axis=0, keepdims=True)
            part_ref[2:3, :] = jnp.sum(mask_u * rv, axis=0, keepdims=True)


def wirelessfedl_forward(Hx, params, state, B, m, *, tile_b=None):
    batch, feat = Hx.shape
    users = state["vars_q"].shape[1]
    hidden = params["w1"].shape[1]
    users_pad = max(8, _round_up(users, 8))
    assert users_pad <= feat, "Hx[:, :users] is read from the hx tile's first lanes"
    assert users_pad <= LANES

    if tile_b is None:
        # Big tiles amortize per-step overhead; keep >= 2 steps so the
        # "parallel" batch axis can shard across both v7x TensorCores.
        tile_b = min(1024, max(128, _round_up((batch + 1) // 2, 128)))
    tile_b = max(128, _round_up(tile_b, 128))

    batch_pad = _round_up(batch, tile_b)
    nt = batch_pad // tile_b

    if batch_pad != batch:
        hx_p = jnp.zeros((batch_pad, feat), jnp.float32).at[:batch].set(Hx)
    else:
        hx_p = Hx                      # no pad copy when already tile-aligned

    # tiny resident weight pads (lane-dense MLP output)
    w2_p = jnp.zeros((hidden, LANES), jnp.float32).at[:, :users].set(params["w2"])
    b2_p = jnp.zeros((1, LANES), jnp.float32).at[:, :users].set(params["b2"])

    kern = functools.partial(_fwd_kernel, tile_b, users_pad, users, batch, nt)

    flops = int(2 * batch_pad * feat * hidden
                + 2 * batch_pad * hidden * LANES
                + 10 * batch_pad * LANES)
    transcendentals = int(batch_pad * (LANES + users_pad))       # tanh + log
    bytes_accessed = int(4 * (batch_pad * feat
                              + feat * hidden + hidden + hidden * LANES + LANES
                              + users_pad * batch_pad + nt * 8 * users_pad))

    grid_spec = pltpu.PrefetchScalarGridSpec(
        num_scalar_prefetch=0,
        grid=(nt,),
        in_specs=[
            pl.BlockSpec((tile_b, feat), lambda i: (i, 0)),          # Hx tile
            pl.BlockSpec((feat, hidden), lambda i: (0, 0)),          # w1 (resident)
            pl.BlockSpec((1, hidden), lambda i: (0, 0)),             # b1 (resident)
            pl.BlockSpec((hidden, LANES), lambda i: (0, 0)),         # w2 (resident)
            pl.BlockSpec((1, LANES), lambda i: (0, 0)),              # b2 (resident)
        ],
        out_specs=(
            pl.BlockSpec((users_pad, tile_b), lambda i: (0, i)),     # pt^T (user-major)
            pl.BlockSpec((None, 8, users_pad), lambda i: (i, 0, 0)),  # partial rows
        ),
    )

    pt_t, partials = pl.pallas_call(
        kern,
        out_shape=(jax.ShapeDtypeStruct((users_pad, batch_pad), jnp.float32),
                   jax.ShapeDtypeStruct((nt, 8, users_pad), jnp.float32)),
        grid_spec=grid_spec,
        compiler_params=pltpu.CompilerParams(
            dimension_semantics=("parallel",),      # shardable across TCs (v7x)
            vmem_limit_bytes=32 * 1024 * 1024),
        cost_estimate=pl.CostEstimate(flops=flops,
                                      transcendentals=transcendentals,
                                      bytes_accessed=bytes_accessed),
    )(hx_p, params["w1"], params["b1"], w2_p, b2_p)

    # ---- tiny (1, users) epilogue in plain XLA (keeps the grid axis parallel)
    sum_q = jnp.sum(partials[:, 0, :users], axis=0, keepdims=True)
    sum_e = jnp.sum(partials[:, 1, :users], axis=0, keepdims=True)
    cnt = jnp.sum(partials[:, 2, :users], axis=0, keepdims=True)

    ef_q = (m / batch) * sum_q                     # Ef['q'] = f_q(...).mean(0)
    # masked mean; guarded against an all-empty user column (PyTorch would NaN)
    ef_e = (-1.0 / B) * sum_e / jnp.maximum(cnt, 1.0)

    k = Hx[0:1, :users]                            # user weights (kw is None)
    lp = jnp.sum(k * state["vars_q"], axis=-1, keepdims=True)               # l_p
    ld = (jnp.sum(state["lam_q"] * (ef_q - state["vars_q"]), axis=-1, keepdims=True)
          + jnp.sum(state["lam_e"] * (ef_e - state["vars_e"]), axis=-1, keepdims=True))

    pt = jnp.transpose(pt_t[:users, :batch])       # (batch, users) return value
    return pt, ef_q, ef_e, lp, ld


def reference_forward(Hx, params, state, B, m):
    """Pure-JAX reference mirroring the PyTorch forward semantics."""
    users = state["vars_q"].shape[1]
    hi = jax.lax.Precision.HIGHEST
    h1 = jnp.maximum(jnp.dot(Hx, params["w1"], precision=hi) + params["b1"], 0.0)
    pt = PMAX / (1.0 + jnp.exp(-(jnp.dot(h1, params["w2"], precision=hi)
                                 + params["b2"])))
    mask = (pt > PMIN_COND).astype(jnp.float32)
    k = Hx[0:1, :users]
    hch = Hx[:, :users]
    lp = jnp.sum(k * state["vars_q"], axis=-1, keepdims=True)
    ef_q = jnp.mean(m * jnp.log(1.0 + pt * hch), axis=0, keepdims=True)
    ef_e = (jnp.sum((-pt / B) * mask, axis=0, keepdims=True)
            / jnp.sum(mask, axis=0, keepdims=True))
    ld = (jnp.sum(state["lam_q"] * (ef_q - state["vars_q"]), axis=-1, keepdims=True)
          + jnp.sum(state["lam_e"] * (ef_e - state["vars_e"]), axis=-1, keepdims=True))
    return pt * mask, ef_q, ef_e, lp, ld


if __name__ == "__main__":
    # Small shapes consistent with the module: `users` transmitters, a batch of
    # channel realizations Hx, scalar bandwidth B and weight m.  batch=200 is
    # not a tile multiple, exercising the 2-step batch grid and the row mask.
    users, feat, hidden = 8, 16, 32
    batch = 200
    B_val, m_val = 10.0, 0.5

    key = jax.random.PRNGKey(0)
    k_hx, k_w1, k_w2, k_b2 = jax.random.split(key, 4)

    Hx = jax.random.uniform(k_hx, (batch, feat), jnp.float32, 0.5, 2.0)

    params = {
        "w1": 0.3 * jax.random.normal(k_w1, (feat, hidden), jnp.float32),
        "b1": jnp.zeros((1, hidden), jnp.float32),
        "w2": 0.3 * jax.random.normal(k_w2, (hidden, users), jnp.float32),
        "b2": 0.1 * jax.random.normal(k_b2, (1, users), jnp.float32),
    }
    # vars start at zero (base.clone()); lambdas at 0.1 (init_dual()).
    state = {
        "vars_q": jnp.zeros((1, users), jnp.float32),
        "vars_e": jnp.zeros((1, users), jnp.float32),
        "lam_q": jnp.full((1, users), 0.1, jnp.float32),
        "lam_e": jnp.full((1, users), 0.1, jnp.float32),
    }

    outs = jax.block_until_ready(
        wirelessfedl_forward(Hx, params, state, B_val, m_val))
    refs = reference_forward(Hx, params, state, B_val, m_val)

    for o, r in zip(outs, refs):
        np.testing.assert_allclose(np.asarray(o), np.asarray(r),
                                   rtol=2e-3, atol=2e-5)

    # TODO(synk): update()/detach()/init_dual()/init_prime() are host-side
    # primal-dual state bookkeeping (not part of the forward hot path) and are
    # not kernelized here.
    print("KERNEL_OK")
</pallas_src>

<mosaic_0001>
module attributes {stable_mosaic.version = 11 : i64} {
  func.func @_fwd_kernel(%arg0: i32, %arg1: memref<128x16xf32, #tpu.memory_space<vmem>>, %arg2: memref<16x32xf32, #tpu.memory_space<vmem>>, %arg3: memref<1x32xf32, #tpu.memory_space<vmem>>, %arg4: memref<32x128xf32, #tpu.memory_space<vmem>>, %arg5: memref<1x128xf32, #tpu.memory_space<vmem>>, %arg6: memref<8x128xf32, #tpu.memory_space<vmem>>, %arg7: memref<1x8x8xf32, #tpu.memory_space<vmem>>) attributes {dimension_semantics = [#tpu.dimension_semantics<parallel>], iteration_bounds = array<i64: 2>, scalar_prefetch = 0 : i64, scratch_operands = 0 : i64, tpu.core_type = #tpu.core_type<tc>, window_params = [{transform_indices = @transform_0, window_bounds = array<i64: 128, 16>}, {pipeline_mode = #tpu.pipeline_mode<synchronous>, transform_indices = @transform_1, window_bounds = array<i64: 16, 32>}, {pipeline_mode = #tpu.pipeline_mode<synchronous>, transform_indices = @transform_2, window_bounds = array<i64: 1, 32>}, {pipeline_mode = #tpu.pipeline_mode<synchronous>, transform_indices = @transform_3, window_bounds = array<i64: 32, 128>}, {pipeline_mode = #tpu.pipeline_mode<synchronous>, transform_indices = @transform_4, window_bounds = array<i64: 1, 128>}, {transform_indices = @transform_5, window_bounds = array<i64: 8, 128>}, {transform_indices = @transform_6, window_bounds = array<i64: 1, 8, 8>}]} {
    %c0 = arith.constant 0 : index
    %c0_0 = arith.constant 0 : index
    %0 = vector.load %arg1[%c0, %c0_0] : memref<128x16xf32, #tpu.memory_space<vmem>>, vector<128x16xf32>
    %c0_1 = arith.constant 0 : index
    %c0_2 = arith.constant 0 : index
    %1 = vector.load %arg2[%c0_1, %c0_2] : memref<16x32xf32, #tpu.memory_space<vmem>>, vector<16x32xf32>
    %cst = arith.constant dense<0.000000e+00> : vector<128x32xf32>
    %2 = tpu.matmul %0, %1, %cst {dimension_numbers = #tpu.dot_dimension_numbers<[1], [0], [0], [1], [0, 0, 1, 1], [], []>} : vector<128x16xf32>, vector<16x32xf32>, vector<128x32xf32> -> vector<128x32xf32>
    %c0_3 = arith.constant 0 : index
    %c0_4 = arith.constant 0 : index
    %3 = vector.load %arg3[%c0_3, %c0_4] : memref<1x32xf32, #tpu.memory_space<vmem>>, vector<1x32xf32>
    %4 = vector.broadcast %3 : vector<1x32xf32> to vector<128x32xf32>
    %5 = arith.addf %2, %4 : vector<128x32xf32>
    %cst_5 = arith.constant 0.000000e+00 : f32
    %6 = vector.broadcast %cst_5 : f32 to vector<128x32xf32>
    %7 = arith.maximumf %5, %6 : vector<128x32xf32>
    %c0_6 = arith.constant 0 : index
    %c0_7 = arith.constant 0 : index
    %8 = vector.load %arg4[%c0_6, %c0_7] : memref<32x128xf32, #tpu.memory_space<vmem>>, vector<32x128xf32>
    %cst_8 = arith.constant dense<0.000000e+00> : vector<128x128xf32>
    %9 = tpu.matmul %7, %8, %cst_8 {dimension_numbers = #tpu.dot_dimension_numbers<[1], [0], [0], [1], [0, 0, 1, 1], [], []>} : vector<128x32xf32>, vector<32x128xf32>, vector<128x128xf32> -> vector<128x128xf32>
    %c0_9 = arith.constant 0 : index
    %c0_10 = arith.constant 0 : index
    %10 = vector.load %arg5[%c0_9, %c0_10] : memref<1x128xf32, #tpu.memory_space<vmem>>, vector<1x128xf32>
    %11 = vector.broadcast %10 : vector<1x128xf32> to vector<128x128xf32>
    %12 = arith.addf %9, %11 : vector<128x128xf32>
    %cst_11 = arith.constant 5.000000e-01 : f32
    %13 = vector.broadcast %cst_11 : f32 to vector<128x128xf32>
    %14 = arith.mulf %13, %12 : vector<128x128xf32>
    %15 = math.tanh %14 : vector<128x128xf32>
    %cst_12 = arith.constant 5.000000e-01 : f32
    %16 = vector.broadcast %cst_12 : f32 to vector<128x128xf32>
    %17 = arith.mulf %16, %15 : vector<128x128xf32>
    %cst_13 = arith.constant 5.000000e-01 : f32
    %18 = vector.broadcast %cst_13 : f32 to vector<128x128xf32>
    %19 = arith.addf %17, %18 : vector<128x128xf32>
    %cst_14 = arith.constant 1.000000e-10 : f32
    %20 = vector.broadcast %cst_14 : f32 to vector<128x128xf32>
    %21 = arith.cmpf ogt, %19, %20 : vector<128x128xf32>
    %22 = arith.extui %21 : vector<128x128xi1> to vector<128x128xi32>
    %23 = arith.sitofp %22 : vector<128x128xi32> to vector<128x128xf32>
    %24 = arith.mulf %19, %23 : vector<128x128xf32>
    %25 = tpu.transpose %24, [1, 0] : vector<128x128xf32> -> vector<128x128xf32>
    %26 = vector.extract_strided_slice %25 {offsets = [0, 0], sizes = [8, 128], strides = [1, 1]} : vector<128x128xf32> to vector<8x128xf32>
    %c0_15 = arith.constant 0 : index
    %c0_16 = arith.constant 0 : index
    %27 = vector.load %arg6[%c0_15, %c0_16] : memref<8x128xf32, #tpu.memory_space<vmem>>, vector<8x128xf32>
    tpu.vector_store %arg6[%c0_15, %c0_16], %26 {strides = array<i32>} : memref<8x128xf32, #tpu.memory_space<vmem>>, vector<8x128xf32>,
    %28 = vector.extract_strided_slice %19 {offsets = [0, 0], sizes = [128, 8], strides = [1, 1]} : vector<128x128xf32> to vector<128x8xf32>
    %29 = vector.extract_strided_slice %24 {offsets = [0, 0], sizes = [128, 8], strides = [1, 1]} : vector<128x128xf32> to vector<128x8xf32>
    %30 = vector.extract_strided_slice %23 {offsets = [0, 0], sizes = [128, 8], strides = [1, 1]} : vector<128x128xf32> to vector<128x8xf32>
    %31 = vector.extract_strided_slice %0 {offsets = [0, 0], sizes = [128, 8], strides = [1, 1]} : vector<128x16xf32> to vector<128x8xf32>
    %32 = arith.mulf %28, %31 : vector<128x8xf32>
    %cst_17 = arith.constant 1.000000e+00 : f32
    %33 = vector.broadcast %cst_17 : f32 to vector<128x8xf32>
    %34 = arith.addf %33, %32 : vector<128x8xf32>
    %35 = math.log %34 : vector<128x8xf32>
    %cst_18 = arith.constant dense<0.000000e+00> : vector<8xf32>
    %36 = vector.multi_reduction <add>, %35, %cst_18 [0] : vector<128x8xf32> to vector<8xf32>
    %37 = vector.shape_cast %36 : vector<8xf32> to vector<1x8xf32>
    %c0_19 = arith.constant 0 : index
    %c0_20 = arith.constant 0 : index
    %c0_21 = arith.constant 0 : index
    %38 = vector.load %arg7[%c0_19, %c0_20, %c0_21] : memref<1x8x8xf32, #tpu.memory_space<vmem>>, vector<1x1x8xf32>
    %39 = vector.shape_cast %38 : vector<1x1x8xf32> to vector<1x8xf32>
    %40 = vector.shape_cast %37 : vector<1x8xf32> to vector<1x1x8xf32>
    tpu.vector_store %arg7[%c0_19, %c0_20, %c0_21], %40 {strides = array<i32>} : memref<1x8x8xf32, #tpu.memory_space<vmem>>, vector<1x1x8xf32>,
    %cst_22 = arith.constant dense<0.000000e+00> : vector<8xf32>
    %41 = vector.multi_reduction <add>, %29, %cst_22 [0] : vector<128x8xf32> to vector<8xf32>
    %42 = vector.shape_cast %41 : vector<8xf32> to vector<1x8xf32>
    %c0_23 = arith.constant 0 : index
    %c1 = arith.constant 1 : index
    %c0_24 = arith.constant 0 : index
    %43 = vector.load %arg7[%c0_23, %c1, %c0_24] : memref<1x8x8xf32, #tpu.memory_space<vmem>>, vector<1x1x8xf32>
    %44 = vector.shape_cast %43 : vector<1x1x8xf32> to vector<1x8xf32>
    %45 = vector.shape_cast %42 : vector<1x8xf32> to vector<1x1x8xf32>
    tpu.vector_store %arg7[%c0_23, %c1, %c0_24], %45 {strides = array<i32>} : memref<1x8x8xf32, #tpu.memory_space<vmem>>, vector<1x1x8xf32>,
    %cst_25 = arith.constant dense<0.000000e+00> : vector<8xf32>
    %46 = vector.multi_reduction <add>, %30, %cst_25 [0] : vector<128x8xf32> to vector<8xf32>
    %47 = vector.shape_cast %46 : vector<8xf32> to vector<1x8xf32>
    %c0_26 = arith.constant 0 : index
    %c2 = arith.constant 2 : index
    %c0_27 = arith.constant 0 : index
    %48 = vector.load %arg7[%c0_26, %c2, %c0_27] : memref<1x8x8xf32, #tpu.memory_space<vmem>>, vector<1x1x8xf32>
    %49 = vector.shape_cast %48 : vector<1x1x8xf32> to vector<1x8xf32>
    %50 = vector.shape_cast %47 : vector<1x8xf32> to vector<1x1x8xf32>
    tpu.vector_store %arg7[%c0_26, %c2, %c0_27], %50 {strides = array<i32>} : memref<1x8x8xf32, #tpu.memory_space<vmem>>, vector<1x1x8xf32>,
    %c1_i32 = arith.constant 1 : i32
    %51 = arith.cmpi eq, %arg0, %c1_i32 : i32
    %52 = arith.extui %51 : i1 to i32
    %c0_i32 = arith.constant 0 : i32
    %53 = arith.cmpi ne, %52, %c0_i32 : i32
    scf.if %53 {
      %54 = tpu.iota {dimensions = array<i32: 0>} : vector<128x1xi32>
      %c72_i32 = arith.constant 72 : i32
      %55 = vector.broadcast %c72_i32 : i32 to vector<128x1xi32>
      %56 = arith.cmpi slt, %54, %55 : vector<128x1xi32>
      %57 = arith.extui %56 : vector<128x1xi1> to vector<128x1xi32>
      %58 = arith.sitofp %57 : vector<128x1xi32> to vector<128x1xf32>
      %59 = vector.broadcast %58 : vector<128x1xf32> to vector<128x8xf32>
      %60 = arith.mulf %29, %59 : vector<128x8xf32>
      %cst_28 = arith.constant dense<0.000000e+00> : vector<8xf32>
      %61 = vector.multi_reduction <add>, %60, %cst_28 [0] : vector<128x8xf32> to vector<8xf32>
      %62 = vector.shape_cast %61 : vector<8xf32> to vector<1x8xf32>
      %c0_29 = arith.constant 0 : index
      %c1_30 = arith.constant 1 : index
      %c0_31 = arith.constant 0 : index
      %63 = vector.load %arg7[%c0_29, %c1_30, %c0_31] : memref<1x8x8xf32, #tpu.memory_space<vmem>>, vector<1x1x8xf32>
      %64 = vector.shape_cast %63 : vector<1x1x8xf32> to vector<1x8xf32>
      %65 = vector.shape_cast %62 : vector<1x8xf32> to vector<1x1x8xf32>
      tpu.vector_store %arg7[%c0_29, %c1_30, %c0_31], %65 {strides = array<i32>} : memref<1x8x8xf32, #tpu.memory_space<vmem>>, vector<1x1x8xf32>,
      %66 = vector.broadcast %58 : vector<128x1xf32> to vector<128x8xf32>
      %67 = arith.mulf %30, %66 : vector<128x8xf32>
      %cst_32 = arith.constant dense<0.000000e+00> : vector<8xf32>
      %68 = vector.multi_reduction <add>, %67, %cst_32 [0] : vector<128x8xf32> to vector<8xf32>
      %69 = vector.shape_cast %68 : vector<8xf32> to vector<1x8xf32>
      %c0_33 = arith.constant 0 : index
      %c2_34 = arith.constant 2 : index
      %c0_35 = arith.constant 0 : index
      %70 = vector.load %arg7[%c0_33, %c2_34, %c0_35] : memref<1x8x8xf32, #tpu.memory_space<vmem>>, vector<1x1x8xf32>
      %71 = vector.shape_cast %70 : vector<1x1x8xf32> to vector<1x8xf32>
      %72 = vector.shape_cast %69 : vector<1x8xf32> to vector<1x1x8xf32>
      tpu.vector_store %arg7[%c0_33, %c2_34, %c0_35], %72 {strides = array<i32>} : memref<1x8x8xf32, #tpu.memory_space<vmem>>, vector<1x1x8xf32>,
    } else {
    }
    return
  }
  func.func @transform_0(%arg0: i32) -> (i32, i32) {
    %c0_i32 = arith.constant 0 : i32
    %c0_i32_0 = arith.constant 0 : i32
    return %arg0, %c0_i32 : i32, i32
  }
  func.func @transform_1(%arg0: i32) -> (i32, i32) {
    %c0_i32 = arith.constant 0 : i32
    %c0_i32_0 = arith.constant 0 : i32
    %c0_i32_1 = arith.constant 0 : i32
    return %c0_i32, %c0_i32_0 : i32, i32
  }
  func.func @transform_2(%arg0: i32) -> (i32, i32) {
    %c0_i32 = arith.constant 0 : i32
    %c0_i32_0 = arith.constant 0 : i32
    %c0_i32_1 = arith.constant 0 : i32
    return %c0_i32, %c0_i32_0 : i32, i32
  }
  func.func @transform_3(%arg0: i32) -> (i32, i32) {
    %c0_i32 = arith.constant 0 : i32
    %c0_i32_0 = arith.constant 0 : i32
    %c0_i32_1 = arith.constant 0 : i32
    return %c0_i32, %c0_i32_0 : i32, i32
  }
  func.func @transform_4(%arg0: i32) -> (i32, i32) {
    %c0_i32 = arith.constant 0 : i32
    %c0_i32_0 = arith.constant 0 : i32
    %c0_i32_1 = arith.constant 0 : i32
    return %c0_i32, %c0_i32_0 : i32, i32
  }
  func.func @transform_5(%arg0: i32) -> (i32, i32) {
    %c0_i32 = arith.constant 0 : i32
    %c0_i32_0 = arith.constant 0 : i32
    return %c0_i32, %arg0 : i32, i32
  }
  func.func @transform_6(%arg0: i32) -> (i32, i32, i32) {
    %c0_i32 = arith.constant 0 : i32
    %c0_i32_0 = arith.constant 0 : i32
    %c0_i32_1 = arith.constant 0 : i32
    return %arg0, %c0_i32, %c0_i32_0 : i32, i32, i32
  }
}

</mosaic_0001>

<bundles_post_ra>
// kernel: tpu_custom_call.1
= control target key start
LH: loop header
LB: loop body
LE: loop exit
PB: predicated region body
PF: predicated region fallthrough
CT: control target
= control target key end

     0   :  { %12 = vsyncpa [#allocation3], 0  ;;  %s2306_s0 = inlined_call_operand.vmem [shape: f32[256,16], index: 0, kind: input, shape index: {}]   ;;  %s2307_s1 = inlined_call_operand.vmem [shape: f32[16,32], index: 1, kind: input, shape index: {}]   ;;  %s2308_s2 = inlined_call_operand.vmem [shape: f32[1,32], index: 2, kind: input, shape index: {}]   ;;  %s2309_s3 = inlined_call_operand.vmem [shape: f32[32,128], index: 3, kind: input, shape index: {}]   ;;  %s2310_s4 = inlined_call_operand.vmem [shape: f32[1,128], index: 4, kind: input, shape index: {}]   ;;  %s2311_s5 = inlined_call_operand.hbm [shape: f32[8,256], index: 5, kind: output, shape index: {0}]   ;;  %s2312_s6 = inlined_call_operand.hbm [shape: f32[2,8,8], index: 6, kind: output, shape index: {1}]  }
   0x1   :  { %14 = vsyncpa [#allocation3 + $0x1], 0 }
   0x2   :  { %15 = vsyncpa [#allocation5], 0 }
   0x3   :  { %17 = vsyncpa [#allocation5 + $0x1], 0  ;;  %s1762_s21 = smov 0   ;;  %s1764_s22 = smov 0  }
   0x4   :  { %s1766_s23 = smov 0   ;;  %s1768_s24 = smov 0  }
   0x5 LB: > { %s1783_s25 = sadd.s32 4294967295, %s1722_s24   ;;  %s1344_s26 = sadd.s32 4294967294, %s1722_s24   ;;  %s1722_s24 = sphi %s1768_s24, %s2318_s24   ;;  %s1718_s23 = sphi %s1766_s23, %s2317_s23   ;;  %s1714_s22 = sphi %s1764_s22, %s2316_s22   ;;  %s1710_s21 = sphi %s1762_s21, %s2315_s21  }
   0x6   : > { %s1787_s27 = sadd.s32 1, %s1722_s24   ;;  %s140_s28 = sadd.s32 1, %s1718_s23 }
   0x7   : > { %s137_s29 = ssub.s32 %s1722_s24, %s1787_s27  ;;  %p150_p0 = scmp.ne.s32.totalorder %s1718_s23, %s1714_s22 }
   0x8   : > { %p138_p1 = scmp.eq.s32.totalorder %s137_s29, 0  ;;  %p151_p2 = scmp.eq.s32.totalorder %s1783_s25, 1 }
   0x9   : > { %p156_p3 = scmp.ne.s32.totalorder %s1714_s22, %s1710_s21  ;;  %p157_p4 = scmp.eq.s32.totalorder %s1344_s26, 1 }
   0xa   : > { %s1798_s30 = scalar_select %p138_p1, %s1718_s23, %s140_s28  }
   0xb   : > { %p1800_p5 = por %p151_p2, %p150_p0  ;;  %p1804_p6 = por %p157_p4, %p156_p3 }
   0xc   : > { %p1347_p7 = scmp.ge.s32.totalorder %s1722_s24, 1  ;;  %p222_p8 = scmp.lt.s32.totalorder %s1722_s24, 3 }
   0xe   : > { %p223_p9 = pnand %p1347_p7, %p222_p8 }
   0xf   : > { %v279_v0 = vld [vmem:[%s2307_s1] sm:$0xff] (!%p223_p9)  ;;  %v280_v1 = vld [vmem:[%s2307_s1 + $0x8] sm:$0xff] (!%p223_p9)  ;;  %s1350_s13 = sshll.u32 (!%p223_p9), %s1783_s25, 4  ;;  %vm288_vm0 = vcmask (!%p223_p9), 130048   ;;  %v500_v22 = vld [vmem:[%s2309_s3 + $0x10] sm:$0xff] (!%p223_p9)  ;;  %vm509_vm1 = vcmask (!%p223_p9), 261120  }
  0x10   : > { %226 = sbr.rel (%p223_p9) target bundleno = 680 (0x2a8), region = 40  ;;  %v498_v2 = vld [vmem:[%s2309_s3] sm:$0xff] (!%p223_p9)  ;;  %v1507_v3 = vpack.c.bf16 (!%p223_p9), %v280_v1, %v279_v0  ;;  %p258_p10 = scmp.lt.s32.totalorder (!%p223_p9), %s1350_s13, 31  ;;  %v499_v4 = vld [vmem:[%s2309_s3 + $0x8] sm:$0xff] (!%p223_p9)  ;;  %v501_v23 = vld [vmem:[%s2309_s3 + $0x18] sm:$0xff] (!%p223_p9)  ;;  %vm928_vm2 = vcmask (!%p223_p9), 64512  }
  0x11   : > { %v1511_v5 = vpack.c.bf16 (!%p223_p9), %v499_v4, %v498_v2  ;;  %v1515_v24 = vpack.c.bf16 (!%p223_p9), %v501_v23, %v500_v22  ;;  %v1352_v25 = vld [vmem:[%s2308_s2] ss:$0 sm:$0xff] (!%p223_p9)  ;;  %s2182_s15 = sand.u32 (!%p223_p9), 1, %s1714_s22   ;;  %p1402_p11 = scmp.ne.s32.totalorder (!%p223_p9), %s1783_s25, 1 }
  0x12   : > { %1508 = vmatprep.subr.bf16.mxu0 (!%p223_p9), %v1507_v3  ;;  %s1348_s16 = sshll.u32 (!%p223_p9), %s2182_s15, 3 }
  0x13   : > { %1510 = vmatpush3.bf16.msra.mxu0 (!%p223_p9), %v1507_v3  ;;  %1512 = vmatprep.subr.bf16.mxu1 (!%p223_p9), %v1511_v5  ;;  %s2187_s17 = scalar_lea.vmem (!%p223_p9), [#allocation4], %s1348_s16 }
  0x14   : > { %1514 = vmatpush3.bf16.msra.mxu1 (!%p223_p9), %v1511_v5 }
  0x15   : > { %1516 = vmatprep.subr.bf16.mxu1 (!%p223_p9), %v1515_v24 }
  0x17   : > { %s2320_s13 = smov (!%p258_p10, %s1350_s13), 31 }
  0x18   : > { %s1351_s18 = sshll.u32 %s2320_s13, 3  ;;  %1518 = vmatpush3.bf16.msra.mxu1 %v1515_v24 }
  0x19   : > { %s1826_s26 = scalar_lea.vmem %s2306_s0, %s1351_s18  ;;  %s2198_s18 = scalar_lea.vmem [#allocation2], %s1348_s16 }
  0x1a   : > { %v1829_v6 = vld [vmem:[%s1826_s26] sm:$0xff]  ;;  %v1832_v7 = vld [vmem:[%s1826_s26 + $0x8] sm:$0xff]  ;;  %v1835_v8 = vld [vmem:[%s1826_s26 + $0x10] sm:$0xff] }
  0x1b   : > { %1451 = vmatprep.mubr.msk.f32.mxu0 %vm288_vm0, %v1829_v6  ;;  %v1844_v9 = vld [vmem:[%s1826_s26 + $0x18] sm:$0xff]  ;;  %v1847_v10 = vld [vmem:[%s1826_s26 + $0x20] sm:$0xff]  ;;  %v1854_v11 = vld [vmem:[%s1826_s26 + $0x28] sm:$0xff] }
  0x1c   : > { %1452 = vmatmul.mubr.msk.f32.vlgmr.msra.gmra.mrb[0].mxu0 %vm288_vm0, %v1832_v7  ;;  %v1857_v12 = vld [vmem:[%s1826_s26 + $0x30] sm:$0xff]  ;;  %v1864_v13 = vld [vmem:[%s1826_s26 + $0x38] sm:$0xff]  ;;  %v1867_v14 = vld [vmem:[%s1826_s26 + $0x40] sm:$0xff] }
  0x1d   : > { %1454 = vmatprep.mubr.msk.f32.mxu0 %vm288_vm0, %v1835_v8  ;;  %v1874_v15 = vld [vmem:[%s1826_s26 + $0x48] sm:$0xff]  ;;  %v1877_v16 = vld [vmem:[%s1826_s26 + $0x50] sm:$0xff]  ;;  %v1884_v17 = vld [vmem:[%s1826_s26 + $0x58] sm:$0xff] }
  0x1e   : > { %v1887_v18 = vld [vmem:[%s1826_s26 + $0x60] sm:$0xff]  ;;  %v1894_v19 = vld [vmem:[%s1826_s26 + $0x68] sm:$0xff]  ;;  %v1897_v20 = vld [vmem:[%s1826_s26 + $0x70] sm:$0xff] }
  0x1f   : > { %v1904_v21 = vld [vmem:[%s1826_s26 + $0x78] sm:$0xff] }
  0x20   : > { %1455 = vmatmul.mubr.msk.f32.gmra.mrb[2].mxu0 %vm288_vm0, %v1844_v9 }
  0x21   : > { %1457 = vmatprep.mubr.msk.f32.mxu0 %vm288_vm0, %v1847_v10 }
  0x24   : > { %1458 = vmatmul.mubr.msk.f32.gmra.mrb[4].mxu0 %vm288_vm0, %v1854_v11 }
  0x25   : > { %1460 = vmatprep.mubr.msk.f32.mxu0 %vm288_vm0, %v1857_v12 }
  0x28   : > { %1461 = vmatmul.mubr.msk.f32.gmra.mrb[6].mxu0 %vm288_vm0, %v1864_v13 }
  0x29   : > { %1463 = vmatprep.mubr.msk.f32.mxu0 %vm288_vm0, %v1867_v14 }
  0x2c   : > { %1464 = vmatmul.mubr.msk.f32.gmra.mrb[8].mxu0 %vm288_vm0, %v1874_v15 }
  0x2d   : > { %1466 = vmatprep.mubr.msk.f32.mxu0 %vm288_vm0, %v1877_v16 }
  0x30   : > { %1467 = vmatmul.mubr.msk.f32.gmra.mrb[10].mxu0 %vm288_vm0, %v1884_v17 }
  0x31   : > { %1469 = vmatprep.mubr.msk.f32.mxu0 %vm288_vm0, %v1887_v18 }
  0x34   : > { %1470 = vmatmul.mubr.msk.f32.gmra.mrb[12].mxu0 %vm288_vm0, %v1894_v19 }
  0x35   : > { %1472 = vmatprep.mubr.msk.f32.mxu0 %vm288_vm0, %v1897_v20 }
  0x38   : > { %1473 = vmatmul.mubr.msk.f32.gmra.mrb[14].mxu0 %vm288_vm0, %v1904_v21 }
  0xef   : > { %v1453_v26 = vpop.f32.mrb[0].mxu0 }
  0xf0   : > { %v409_v27 = vadd.f32 %v1453_v26, %v1352_v25  ;;  %v403_v28 = vpop.f32.mrb[1].mxu0 }
  0xf1   : > { %v404_v29 = vadd.f32 %v1352_v25, %v403_v28 }
  0xf2   : > { %v483_v32 = vmax.f32 %v409_v27, 0.0  ;;  %v1936_v27 = vld [vmem:[%s2310_s4] ss:$0 sm:$0xff] }
  0xf3   : > { %v482_v30 = vmax.f32 %v404_v29, 0.0  ;;  %v1456_v31 = vpop.f32.mrb[2].mxu0 }
  0xf4   : > { %v419_v33 = vadd.f32 %v1456_v31, %v1352_v25  ;;  %v413_v34 = vpop.f32.mrb[3].mxu0 }
  0xf5   : > { %v414_v35 = vadd.f32 %v1352_v25, %v413_v34  ;;  %1483 = vmatprep.mubr.msk.f32.mxu1 %vm509_vm1, %v482_v30 }
  0xf6   : > { %v485_v36 = vmax.f32 %v419_v33, 0.0  ;;  %1484 = vmatmul.mubr.msk.f32.vlgmr.msra.gmra.mrb[0].mxu1 %vm509_vm1, %v483_v32 }
  0xf7   : > { %v484_v37 = vmax.f32 %v414_v35, 0.0  ;;  %v1459_v38 = vpop.f32.mrb[4].mxu0 }
  0xf8   : > { %v429_v39 = vadd.f32 %v1459_v38, %v1352_v25  ;;  %v423_v40 = vpop.f32.mrb[5].mxu0 }
  0xf9   : > { %v424_v41 = vadd.f32 %v1352_v25, %v423_v40  ;;  %1486 = vmatprep.mubr.msk.f32.mxu1 %vm509_vm1, %v484_v37 }
  0xfa   : > { %v487_v42 = vmax.f32 %v429_v39, 0.0  ;;  %1487 = vmatmul.mubr.msk.f32.gmra.mrb[2].mxu1 %vm509_vm1, %v485_v36 }
  0xfb   : > { %v486_v43 = vmax.f32 %v424_v41, 0.0  ;;  %v1462_v44 = vpop.f32.mrb[6].mxu0 }
  0xfc   : > { %v439_v45 = vadd.f32 %v1462_v44, %v1352_v25  ;;  %v433_v46 = vpop.f32.mrb[7].mxu0 }
  0xfd   : > { %v434_v47 = vadd.f32 %v1352_v25, %v433_v46  ;;  %1489 = vmatprep.mubr.msk.f32.mxu1 %vm509_vm1, %v486_v43 }
  0xfe   : > { %v489_v48 = vmax.f32 %v439_v45, 0.0  ;;  %1490 = vmatmul.mubr.msk.f32.gmra.mrb[4].mxu1 %vm509_vm1, %v487_v42 }
  0xff   : > { %v488_v49 = vmax.f32 %v434_v47, 0.0  ;;  %v1465_v50 = vpop.f32.mrb[8].mxu0 }
 0x100   : > { %v449_v51 = vadd.f32 %v1465_v50, %v1352_v25  ;;  %v443_v52 = vpop.f32.mrb[9].mxu0 }
 0x101   : > { %v444_v53 = vadd.f32 %v1352_v25, %v443_v52  ;;  %1492 = vmatprep.mubr.msk.f32.mxu1 %vm509_vm1, %v488_v49 }
 0x102   : > { %v491_v54 = vmax.f32 %v449_v51, 0.0  ;;  %1493 = vmatmul.mubr.msk.f32.gmra.mrb[6].mxu1 %vm509_vm1, %v489_v48 }
 0x103   : > { %v490_v55 = vmax.f32 %v444_v53, 0.0  ;;  %v1468_v56 = vpop.f32.mrb[10].mxu0 }
 0x104   : > { %v459_v57 = vadd.f32 %v1468_v56, %v1352_v25  ;;  %v453_v58 = vpop.f32.mrb[11].mxu0 }
 0x105   : > { %v454_v59 = vadd.f32 %v1352_v25, %v453_v58  ;;  %1495 = vmatprep.mubr.msk.f32.mxu1 %vm509_vm1, %v490_v55 }
 0x106   : > { %v493_v60 = vmax.f32 %v459_v57, 0.0  ;;  %1496 = vmatmul.mubr.msk.f32.gmra.mrb[8].mxu1 %vm509_vm1, %v491_v54 }
 0x107   : > { %v492_v61 = vmax.f32 %v454_v59, 0.0  ;;  %v1471_v62 = vpop.f32.mrb[12].mxu0 }
 0x108   : > { %v469_v63 = vadd.f32 %v1471_v62, %v1352_v25  ;;  %v463_v0 = vpop.f32.mrb[13].mxu0 }
 0x109   : > { %v464_v1 = vadd.f32 %v1352_v25, %v463_v0  ;;  %1498 = vmatprep.mubr.msk.f32.mxu1 %vm509_vm1, %v492_v61 }
 0x10a   : > { %v495_v2 = vmax.f32 %v469_v63, 0.0  ;;  %1499 = vmatmul.mubr.msk.f32.gmra.mrb[10].mxu1 %vm509_vm1, %v493_v60 }
 0x10b   : > { %v494_v3 = vmax.f32 %v464_v1, 0.0  ;;  %v1474_v4 = vpop.f32.mrb[14].mxu0 }
 0x10c   : > { %v479_v5 = vadd.f32 %v1474_v4, %v1352_v25  ;;  %v473_v22 = vpop.f32.mrb[15].mxu0 }
 0x10d   : > { %v474_v23 = vadd.f32 %v1352_v25, %v473_v22  ;;  %1501 = vmatprep.mubr.msk.f32.mxu1 %vm509_vm1, %v494_v3 }
 0x10e   : > { %v497_v24 = vmax.f32 %v479_v5, 0.0  ;;  %1502 = vmatmul.mubr.msk.f32.gmra.mrb[12].mxu1 %vm509_vm1, %v495_v2 }
 0x10f   : > { %v496_v26 = vmax.f32 %v474_v23, 0.0 }
 0x111   : > { %1504 = vmatprep.mubr.msk.f32.mxu1 %vm509_vm1, %v496_v26 }
 0x112   : > { %1505 = vmatmul.mubr.msk.f32.gmra.mrb[14].mxu1 %vm509_vm1, %v497_v24 }
 0x1c9   : > { %v1485_v28 = vpop.f32.mrb[0].mxu1 }
 0x1ca   : > { %v630_v29 = vadd.f32 %v1485_v28, %v1936_v27  ;;  %v624_v30 = vpop.f32.mrb[1].mxu1 }
 0x1cb   : > { %v625_v25 = vadd.f32 %v1936_v27, %v624_v30 }
 0x1cc   : > { %v704_v31 = vmul.f32 0.5, %v630_v29 }
 0x1cd   : > { %v703_v32 = vmul.f32 0.5, %v625_v25  ;;  %v1488_v33 = vpop.f32.mrb[2].mxu1 }
 0x1ce   : > { %1564 = vtanh.f32 %v704_v31  ;;  %v640_v34 = vadd.f32 %v1488_v33, %v1936_v27  ;;  %v634_v35 = vpop.f32.mrb[3].mxu1 }
 0x1cf   : > { %1566 = vtanh.f32 %v703_v32  ;;  %v635_v36 = vadd.f32 %v1936_v27, %v634_v35 }
 0x1d0   : > { %v706_v37 = vmul.f32 0.5, %v640_v34 }
 0x1d1   : > { %v705_v38 = vmul.f32 0.5, %v635_v36  ;;  %v1491_v39 = vpop.f32.mrb[4].mxu1 }
 0x1d2   : > { %1568 = vtanh.f32 %v706_v37  ;;  %v650_v40 = vadd.f32 %v1491_v39, %v1936_v27  ;;  %v644_v41 = vpop.f32.mrb[5].mxu1 }
 0x1d3   : > { %1570 = vtanh.f32 %v705_v38  ;;  %v645_v42 = vadd.f32 %v1936_v27, %v644_v41 }
 0x1d4   : > { %v708_v43 = vmul.f32 0.5, %v650_v40 }
 0x1d5   : > { %v707_v44 = vmul.f32 0.5, %v645_v42  ;;  %v1494_v45 = vpop.f32.mrb[6].mxu1 }
 0x1d6   : > { %1572 = vtanh.f32 %v708_v43  ;;  %v660_v46 = vadd.f32 %v1494_v45, %v1936_v27  ;;  %v654_v47 = vpop.f32.mrb[7].mxu1 }
 0x1d7   : > { %1574 = vtanh.f32 %v707_v44  ;;  %v655_v48 = vadd.f32 %v1936_v27, %v654_v47 }
 0x1d8   : > { %v1565_v49 = vpop.eup %1564  ;;  %v710_v50 = vmul.f32 0.5, %v660_v46 }
 0x1d9   : > { %v1567_v51 = vpop.eup %1566  ;;  %v736_v52 = vmul.f32 0.5, %v1565_v49  ;;  %v709_v53 = vmul.f32 0.5, %v655_v48  ;;  %v1497_v54 = vpop.f32.mrb[8].mxu1 }
 0x1da   : > { %v735_v55 = vmul.f32 0.5, %v1567_v51  ;;  %1576 = vtanh.f32 %v710_v50  ;;  %v670_v56 = vadd.f32 %v1497_v54, %v1936_v27  ;;  %v664_v57 = vpop.f32.mrb[9].mxu1  ;;  %v1724_v51 = vmov 0.0  }
 0x1db   : > { %v1947_v58 = vadd.f32 0.5, %v736_v52  ;;  %1578 = vtanh.f32 %v709_v53  ;;  %v665_v59 = vadd.f32 %v1936_v27, %v664_v57 }
 0x1dc   : > { %v1569_v60 = vpop.eup %1568  ;;  %v751_v61 = vadd.f32 0.5, %v735_v55  ;;  %v712_v62 = vmul.f32 0.5, %v670_v56 }
 0x1dd   : > { %v1571_v63 = vpop.eup %1570  ;;  %v865_v0 = vmul.f32 %v1947_v58, %v1832_v7  ;;  %v738_v1 = vmul.f32 0.5, %v1569_v60  ;;  %v711_v2 = vmul.f32 0.5, %v665_v59  ;;  %v1500_v3 = vpop.f32.mrb[10].mxu1  ;;  %vm768_vm4 = vcmp.gt.f32.partialorder %v1947_v58, 1e-10 }
 0x1de   : > { %v864_v4 = vmul.f32 %v751_v61, %v1829_v6  ;;  %v737_v5 = vmul.f32 0.5, %v1571_v63  ;;  %1580 = vtanh.f32 %v712_v62  ;;  %v680_v22 = vadd.f32 %v1500_v3, %v1936_v27  ;;  %v674_v23 = vpop.f32.mrb[11].mxu1 }
 0x1df   : > { %v881_v24 = vadd.f32 1.0, %v865_v0  ;;  %v1954_v26 = vadd.f32 0.5, %v738_v1  ;;  %1582 = vtanh.f32 %v711_v2  ;;  %v675_v28 = vadd.f32 %v1936_v27, %v674_v23 }
 0x1e0   : > { %v1573_v29 = vpop.eup %1572  ;;  %v880_v30 = vadd.f32 1.0, %v864_v4  ;;  %v1957_v7 = vadd.f32 0.5, %v737_v5  ;;  %v714_v25 = vmul.f32 0.5, %v680_v22  ;;  %vm767_vm3 = vcmp.gt.f32.partialorder %v751_v61, 1e-10 }
 0x1e1   : > { %v1575_v6 = vpop.eup %1574  ;;  %1584 = vlog2.f32 %v881_v24  ;;  %v867_v31 = vmul.f32 %v1954_v26, %v1844_v9  ;;  %v740_v32 = vmul.f32 0.5, %v1573_v29  ;;  %v713_v33 = vmul.f32 0.5, %v675_v28  ;;  %v1503_v34 = vpop.f32.mrb[12].mxu1 }
 0x1e2   : > { %1586 = vlog2.f32 %v880_v30  ;;  %v866_v35 = vmul.f32 %v1957_v7, %v1835_v8  ;;  %v739_v36 = vmul.f32 0.5, %v1575_v6  ;;  %v690_v37 = vadd.f32 %v1503_v34, %v1936_v27  ;;  %v684_v38 = vpop.f32.mrb[13].mxu1 }
 0x1e3   : > { %v883_v39 = vadd.f32 1.0, %v867_v31  ;;  %v1965_v40 = vadd.f32 0.5, %v740_v32  ;;  %1588 = vtanh.f32 %v714_v25  ;;  %v685_v41 = vadd.f32 %v1936_v27, %v684_v38 }
 0x1e4   : > { %v1577_v42 = vpop.eup %1576  ;;  %v882_v43 = vadd.f32 1.0, %v866_v35  ;;  %v1968_v9 = vadd.f32 0.5, %v739_v36  ;;  %1590 = vtanh.f32 %v713_v33  ;;  %v716_v44 = vmul.f32 0.5, %v690_v37 }
 0x1e5   : > { %v1579_v45 = vpop.eup %1578  ;;  %1592 = vlog2.f32 %v883_v39  ;;  %v869_v8 = vmul.f32 %v1965_v40, %v1854_v11  ;;  %v742_v46 = vmul.f32 0.5, %v1577_v42  ;;  %v715_v47 = vmul.f32 0.5, %v685_v41  ;;  %v1506_v48 = vpop.f32.mrb[14].mxu1 }
 0x1e6   : > { %1594 = vlog2.f32 %v882_v43  ;;  %v868_v49 = vmul.f32 %v1968_v9, %v1847_v10  ;;  %v741_v50 = vmul.f32 0.5, %v1579_v45  ;;  %v1386_v52 = vsel %vm767_vm3, 1.0, %v1724_v51  ;;  %v694_v53 = vpop.f32.mrb[15].mxu1 }
 0x1e7   : > { %v885_v54 = vadd.f32 1.0, %v869_v8  ;;  %v1976_v55 = vadd.f32 0.5, %v742_v46  ;;  %1596 = vtanh.f32 %v716_v44  ;;  %v815_v56 = vmul.f32 %v1386_v52, %v751_v61 }
 0x1e8   : > { %v1581_v57 = vpop.eup %1580  ;;  %v884_v11 = vadd.f32 1.0, %v868_v49  ;;  %v1978_v59 = vadd.f32 0.5, %v741_v50  ;;  %1598 = vtanh.f32 %v715_v47  ;;  %v1981_v60 = vsel %vm928_vm2, %v1386_v52, 0.0 }
 0x1e9   : > { %v1583_v10 = vpop.eup %1582  ;;  %1600 = vlog2.f32 %v885_v54  ;;  %v871_v62 = vmul.f32 %v1976_v55, %v1864_v13  ;;  %v744_v63 = vmul.f32 0.5, %v1581_v57  ;;  %831 = vxpose.xlu0.b32.start [1/16] (narrow) %v815_v56, 8  ;;  %v1986_v0 = vsel %vm928_vm2, %v815_v56, 0.0 }
 0x1ea   : > { %1602 = vlog2.f32 %v884_v11  ;;  %v870_v61 = vmul.f32 %v1978_v59, %v1857_v12  ;;  %v743_v1 = vmul.f32 0.5, %v1583_v10  ;;  %v700_v2 = vadd.f32 %v1506_v48, %v1936_v27 }
 0x1eb   : > { %v1585_v3 = vpop.eup %1584  ;;  %v887_v4 = vadd.f32 1.0, %v871_v62  ;;  %v1991_v5 = vadd.f32 0.5, %v744_v63  ;;  %v695_v22 = vadd.f32 %v1936_v27, %v694_v53  ;;  %v1997_v13 = vsel %vm768_vm4, 1.0, %v1724_v51 }
 0x1ec   : > { %v1587_v23 = vpop.eup %1586  ;;  %v899_v24 = vmul.f32 0.6931472, %v1585_v3  ;;  %v886_v28 = vadd.f32 1.0, %v870_v61  ;;  %v1999_v29 = vadd.f32 0.5, %v743_v1  ;;  %v718_v12 = vmul.f32 0.5, %v700_v2 }
 0x1ed   : > { %v1589_v30 = vpop.eup %1588  ;;  %v897_v25 = vmul.f32 0.6931472, %v1587_v23  ;;  %1604 = vlog2.f32 %v887_v4  ;;  %v873_v6 = vmul.f32 %v1991_v5, %v1874_v15  ;;  %v717_v31 = vmul.f32 0.5, %v695_v22 }
 0x1ee   : > { %v1591_v32 = vpop.eup %1590  ;;  %v930_v27 = vsel %vm928_vm2, %v899_v24, 0.0  ;;  %1606 = vlog2.f32 %v886_v28  ;;  %v872_v33 = vmul.f32 %v1999_v29, %v1867_v14  ;;  %v746_v34 = vmul.f32 0.5, %v1589_v30 }
 0x1ef   : > { %v1593_v35 = vpop.eup %1592  ;;  %v929_v36 = vsel %vm928_vm2, %v897_v25, 0.0  ;;  %v889_v37 = vadd.f32 1.0, %v873_v6  ;;  %v745_v38 = vmul.f32 0.5, %v1591_v32  ;;  %1608 = vtanh.f32 %v718_v12 }
 0x1f0   : > { %v1595_v39 = vpop.eup %1594  ;;  %v931_v41 = vadd.f32 %v930_v27, %v929_v36  ;;  %v903_v42 = vmul.f32 0.6931472, %v1593_v35  ;;  %v888_v43 = vadd.f32 1.0, %v872_v33  ;;  %v2007_v15 = vadd.f32 0.5, %v746_v34 }
 0x1f1   : > { %v1597_v44 = vpop.eup %1596  ;;  %v901_v45 = vmul.f32 0.6931472, %v1595_v39  ;;  %1610 = vlog2.f32 %v889_v37  ;;  %v2009_v8 = vadd.f32 0.5, %v745_v38  ;;  %v816_v14 = vmul.f32 %v1997_v13, %v1947_v58 }
 0x1f2   : > { %v1599_v46 = vpop.eup %1598  ;;  %v934_v47 = vsel %vm928_vm2, %v903_v42, 0.0  ;;  %1612 = vlog2.f32 %v888_v43  ;;  %v875_v48 = vmul.f32 %v2007_v15, %v1884_v17  ;;  %v748_v49 = vmul.f32 0.5, %v1597_v44 }
 0x1f3   : > { %v1601_v50 = vpop.eup %1600  ;;  %v932_v52 = vsel %vm928_vm2, %v901_v45, 0.0  ;;  %v874_v53 = vmul.f32 %v2009_v8, %v1877_v16  ;;  %v747_v54 = vmul.f32 0.5, %v1599_v46  ;;  %1614 = vtanh.f32 %v717_v31  ;;  %832 = vxpose.xlu0.b32.cont [2/16] (narrow) %v816_v14, 8 }
 0x1f4   : > { %v1603_v56 = vpop.eup %1602  ;;  %v933_v57 = vadd.f32 %v932_v52, %v931_v41  ;;  %v907_v58 = vmul.f32 0.6931472, %v1601_v50  ;;  %v891_v11 = vadd.f32 1.0, %v875_v48  ;;  %v2019_v10 = vadd.f32 0.5, %v748_v49 }
 0x1f5   : > { %v905_v62 = vmul.f32 0.6931472, %v1603_v56  ;;  %v890_v63 = vadd.f32 1.0, %v874_v53  ;;  %v2021_v61 = vadd.f32 0.5, %v747_v54  ;;  %v969_v17 = vsel %vm928_vm2, %v816_v14, 0.0 }
 0x1f6   : > { %v938_v1 = vsel %vm928_vm2, %v907_v58, 0.0  ;;  %v935_v2 = vadd.f32 %v934_v47, %v933_v57  ;;  %1616 = vlog2.f32 %v891_v11  ;;  %v877_v16 = vmul.f32 %v2019_v10, %v1894_v19 }
 0x1f7   : > { %v1605_v3 = vpop.eup %1604  ;;  %v936_v4 = vsel %vm928_vm2, %v905_v62, 0.0  ;;  %1618 = vlog2.f32 %v890_v63  ;;  %v876_v22 = vmul.f32 %v2021_v61, %v1887_v18  ;;  %v970_v23 = vadd.f32 %v969_v17, %v1986_v0 }
 0x1f8   : > { %v1607_v24 = vpop.eup %1606  ;;  %v937_v28 = vadd.f32 %v936_v4, %v935_v2  ;;  %v911_v12 = vmul.f32 0.6931472, %v1605_v3  ;;  %v893_v30 = vadd.f32 1.0, %v877_v16  ;;  %v1007_v25 = vsel %vm928_vm2, %v1997_v13, 0.0 }
 0x1f9   : > { %v1609_v6 = vpop.eup %1608  ;;  %v909_v31 = vmul.f32 0.6931472, %v1607_v24  ;;  %v892_v32 = vadd.f32 1.0, %v876_v22  ;;  %v1008_v19 = vadd.f32 %v1007_v25, %v1981_v60  ;;  %vm769_vm5 = vcmp.gt.f32.partialorder %v1957_v7, 1e-10 }
 0x1fa   : > { %v942_v27 = vsel %vm928_vm2, %v911_v12, 0.0  ;;  %v939_v33 = vadd.f32 %v938_v1, %v937_v28  ;;  %1620 = vlog2.f32 %v893_v30  ;;  %v750_v18 = vmul.f32 0.5, %v1609_v6 }
 0x1fb   : > { %v1611_v0 = vpop.eup %1610  ;;  %v940_v34 = vsel %vm928_vm2, %v909_v31, 0.0  ;;  %1622 = vlog2.f32 %v892_v32  ;;  %v1388_v35 = vsel %vm769_vm5, 1.0, %v1724_v51  ;;  %vm770_vm6 = vcmp.gt.f32.partialorder %v1954_v26, 1e-10 }
 0x1fc   : > { %v1613_v13 = vpop.eup %1612  ;;  %v941_v36 = vadd.f32 %v940_v34, %v939_v33  ;;  %v915_v37 = vmul.f32 0.6931472, %v1611_v0  ;;  %v2039_v38 = vadd.f32 0.5, %v750_v18  ;;  %v817_v60 = vmul.f32 %v1388_v35, %v1957_v7 }
 0x1fd   : > { %v1615_v39 = vpop.eup %1614  ;;  %v913_v41 = vmul.f32 0.6931472, %v1613_v13  ;;  %v1009_v42 = vsel %vm928_vm2, %v1388_v35, 0.0  ;;  %v1389_v43 = vsel %vm770_vm6, 1.0, %v1724_v51  ;;  %vm771_vm7 = vcmp.gt.f32.partialorder %v1968_v9, 1e-10 }
 0x1fe   : > { %v946_v44 = vsel %vm928_vm2, %v915_v37, 0.0  ;;  %v943_v45 = vadd.f32 %v942_v27, %v941_v36  ;;  %v879_v14 = vmul.f32 %v2039_v38, %v1904_v21  ;;  %v749_v46 = vmul.f32 0.5, %v1615_v39  ;;  %833 = vxpose.xlu0.b32.cont [3/16] (narrow) %v817_v60, 8 }
 0x1ff   : > { %v944_v47 = vsel %vm928_vm2, %v913_v41, 0.0  ;;  %v971_v7 = vsel %vm928_vm2, %v817_v60, 0.0  ;;  %v1010_v48 = vadd.f32 %v1009_v42, %v1008_v19  ;;  %v818_v49 = vmul.f32 %v1389_v43, %v1954_v26 }
 0x200   : > { %v1617_v50 = vpop.eup %1616  ;;  %v945_v52 = vadd.f32 %v944_v47, %v943_v45  ;;  %v895_v53 = vadd.f32 1.0, %v879_v14  ;;  %v2051_v54 = vadd.f32 0.5, %v749_v46  ;;  %v972_v56 = vadd.f32 %v971_v7, %v970_v23 }
 0x201   : > { %v1619_v57 = vpop.eup %1618  ;;  %v919_v58 = vmul.f32 0.6931472, %v1617_v50  ;;  %v973_v11 = vsel %vm928_vm2, %v818_v49, 0.0  ;;  %v1011_v21 = vsel %vm928_vm2, %v1389_v43, 0.0  ;;  %v1390_v62 = vsel %vm771_vm7, 1.0, %v1724_v51 }
 0x202   : > { %v917_v63 = vmul.f32 0.6931472, %v1619_v57  ;;  %v947_v17 = vadd.f32 %v946_v44, %v945_v52  ;;  %1624 = vlog2.f32 %v895_v53  ;;  %v878_v26 = vmul.f32 %v2051_v54, %v1897_v20  ;;  %834 = vxpose.xlu0.b32.cont [4/16] (narrow) %v818_v49, 8 }
 0x203   : > { %v950_v1 = vsel %vm928_vm2, %v919_v58, 0.0  ;;  %v974_v2 = vadd.f32 %v973_v11, %v972_v56  ;;  %v1012_v16 = vadd.f32 %v1011_v21, %v1010_v48  ;;  %v819_v3 = vmul.f32 %v1390_v62, %v1968_v9 }
 0x204   : > { %v1621_v4 = vpop.eup %1620  ;;  %v948_v22 = vsel %vm928_vm2, %v917_v63, 0.0  ;;  %v894_v23 = vadd.f32 1.0, %v878_v26  ;;  %v1013_v24 = vsel %vm928_vm2, %v1390_v62, 0.0  ;;  %vm772_vm8 = vcmp.gt.f32.partialorder %v1965_v40, 1e-10 }
 0x205   : > { %v1623_v28 = vpop.eup %1622  ;;  %v949_v12 = vadd.f32 %v948_v22, %v947_v17  ;;  %v923_v30 = vmul.f32 0.6931472, %v1621_v4  ;;  %v975_v20 = vsel %vm928_vm2, %v819_v3, 0.0  ;;  %v1014_v25 = vadd.f32 %v1013_v24, %v1012_v16 }
 0x206   : > { %v921_v6 = vmul.f32 0.6931472, %v1623_v28  ;;  %1626 = vlog2.f32 %v894_v23  ;;  %835 = vxpose.xlu0.b32.cont [5/16] (narrow) %v819_v3, 8  ;;  %v976_v31 = vadd.f32 %v975_v20, %v974_v2  ;;  %v1391_v9 = vsel %vm772_vm8, 1.0, %v1724_v51 }
 0x207   : > { %v954_v32 = vsel %vm928_vm2, %v923_v30, 0.0  ;;  %v951_v19 = vadd.f32 %v950_v1, %v949_v12  ;;  %v820_v27 = vmul.f32 %v1391_v9, %v1965_v40  ;;  %v1015_v33 = vsel %vm928_vm2, %v1391_v9, 0.0 }
 0x208   : > { %v952_v18 = vsel %vm928_vm2, %v921_v6, 0.0  ;;  %v1016_v0 = vadd.f32 %v1015_v33, %v1014_v25  ;;  %vm773_vm9 = vcmp.gt.f32.partialorder %v1978_v59, 1e-10  ;;  %vm774_vm10 = vcmp.gt.f32.partialorder %v1976_v55, 1e-10 }
 0x209   : > { %v953_v34 = vadd.f32 %v952_v18, %v951_v19  ;;  %v977_v35 = vsel %vm928_vm2, %v820_v27, 0.0  ;;  %v1392_v13 = vsel %vm773_vm9, 1.0, %v1724_v51  ;;  %v1393_v36 = vsel %vm774_vm10, 1.0, %v1724_v51 }
 0x20a   : > { %836 = vxpose.xlu0.b32.cont [6/16] (narrow) %v820_v27, 8  ;;  %v978_v37 = vadd.f32 %v977_v35, %v976_v31  ;;  %v821_v40 = vmul.f32 %v1392_v13, %v1978_v59  ;;  %v1017_v60 = vsel %vm928_vm2, %v1392_v13, 0.0  ;;  %v822_v39 = vmul.f32 %v1393_v36, %v1976_v55 }
 0x20b   : > { %v955_v41 = vadd.f32 %v954_v32, %v953_v34  ;;  %v1018_v42 = vadd.f32 %v1017_v60, %v1016_v0  ;;  %v1019_v43 = vsel %vm928_vm2, %v1393_v36, 0.0  ;;  %vm775_vm11 = vcmp.gt.f32.partialorder %v1999_v29, 1e-10 }
 0x20c   : > { %v1625_v44 = vpop.eup %1624  ;;  %v979_v45 = vsel %vm928_vm2, %v821_v40, 0.0  ;;  %v981_v14 = vsel %vm928_vm2, %v822_v39, 0.0  ;;  %v1394_v46 = vsel %vm775_vm11, 1.0, %v1724_v51  ;;  %vm776_vm12 = vcmp.gt.f32.partialorder %v1991_v5, 1e-10 }
 0x20d   : > { %v927_v59 = vmul.f32 0.6931472, %v1625_v44  ;;  %v980_v47 = vadd.f32 %v979_v45, %v978_v37  ;;  %v1020_v7 = vadd.f32 %v1019_v43, %v1018_v42  ;;  %v823_v55 = vmul.f32 %v1394_v46, %v1999_v29 }
 0x20e   : > { %837 = vxpose.xlu0.b32.cont [7/16] (narrow) %v821_v40, 8  ;;  %v1021_v48 = vsel %vm928_vm2, %v1394_v46, 0.0  ;;  %v2088_v49 = vsel %vm776_vm12, 1.0, %v1724_v51  ;;  %vm777_vm13 = vcmp.gt.f32.partialorder %v2009_v8, 1e-10  ;;  %vm966_vm4 = vcmask 57344  }
 0x20f   : > { %v958_v50 = vsel %vm928_vm2, %v927_v59, 0.0  ;;  %v982_v52 = vadd.f32 %v981_v14, %v980_v47  ;;  %v983_v53 = vsel %vm928_vm2, %v823_v55, 0.0  ;;  %v2093_v56 = vadd.f32 %v1021_v48, %v1020_v7 }
 0x210   : > { %v1627_v57 = vpop.eup %1626  ;;  %v2097_v58 = vmul.f32 %v2088_v49, %v1991_v5  ;;  %v1023_v29 = vsel %vm928_vm2, %v2088_v49, 0.0  ;;  %v2102_v11 = vsel %vm777_vm13, 1.0, %v1724_v51  ;;  %vm778_vm14 = vcmp.gt.f32.partialorder %v2007_v15, 1e-10 }
 0x211   : > { %v925_v21 = vmul.f32 0.6931472, %v1627_v57  ;;  %v2105_v62 = vadd.f32 %v983_v53, %v982_v52  ;;  %v1024_v63 = vadd.f32 %v1023_v29, %v2093_v56  ;;  %v2110_v17 = vmul.f32 %v2102_v11, %v2009_v8 }
 0x212   : > { %838 = vxpose.xlu0.b32.cont [8/16] (narrow) %v822_v39, 8  ;;  %v985_v5 = vsel %vm928_vm2, %v2097_v58, 0.0  ;;  %v1025_v26 = vsel %vm928_vm2, %v2102_v11, 0.0  ;;  %v2117_v1 = vsel %vm778_vm14, 1.0, %v1724_v51  ;;  %vm779_vm15 = vcmp.gt.f32.partialorder %v2021_v61, 1e-10 }
 0x213   : > { %v956_v2 = vsel %vm928_vm2, %v925_v21, 0.0  ;;  %v986_v16 = vadd.f32 %v985_v5, %v2105_v62  ;;  %v987_v8 = vsel %vm928_vm2, %v2110_v17, 0.0  ;;  %v1026_v3 = vadd.f32 %v1025_v26, %v1024_v63 }
 0x214   : > { %v957_v4 = vadd.f32 %v956_v2, %v955_v41  ;;  %v2126_v22 = vmul.f32 %v2117_v1, %v2007_v15  ;;  %v1027_v23 = vsel %vm928_vm2, %v2117_v1, 0.0  ;;  %v2131_v24 = vsel %vm779_vm15, 1.0, %v1724_v51 }
 0x215   : > { %v988_v28 = vadd.f32 %v987_v8, %v986_v16  ;;  %v1028_v12 = vadd.f32 %v1027_v23, %v1026_v3  ;;  %v2135_v30 = vmul.f32 %v2131_v24, %v2021_v61  ;;  %v1029_v20 = vsel %vm928_vm2, %v2131_v24, 0.0 }
 0x216   : > { %839 = vxpose.xlu0.b32.cont [9/16] (narrow) %v823_v55, 8  ;;  %v989_v15 = vsel %vm928_vm2, %v2126_v22, 0.0  ;;  %vm780_vm0 = vcmp.gt.f32.partialorder %v2019_v10, 1e-10  ;;  %vm781_vm1 = vcmp.gt.f32.partialorder %v2051_v54, 1e-10  ;;  %v959_v25 = vadd.f32 %v958_v50, %v957_v4 }
 0x217   : > { %v990_v6 = vadd.f32 %v989_v15, %v988_v28  ;;  %v991_v31 = vsel %vm928_vm2, %v2135_v30, 0.0  ;;  %v1030_v9 = vadd.f32 %v1029_v20, %v1028_v12  ;;  %v2146_v61 = vsel %vm780_vm0, 1.0, %v1724_v51 }
 0x218   : > { %v2150_v32 = vmul.f32 %v2146_v61, %v2019_v10  ;;  %v1031_v19 = vsel %vm928_vm2, %v2146_v61, 0.0  ;;  %v2155_v27 = vsel %vm781_vm1, 1.0, %v1724_v51  ;;  %vm782_vm3 = vcmp.gt.f32.partialorder %v2039_v38, 1e-10 }
 0x219   : > { %v992_v33 = vadd.f32 %v991_v31, %v990_v6  ;;  %v1032_v18 = vadd.f32 %v1031_v19, %v1030_v9  ;;  %v2160_v0 = vmul.f32 %v2155_v27, %v2051_v54  ;;  %v1033_v34 = vsel %vm928_vm2, %v2155_v27, 0.0 }
 0x21a   : > { %840 = vxpose.xlu0.b32.cont [10/16] (narrow) %v2097_v58, 8  ;;  %v993_v10 = vsel %vm928_vm2, %v2150_v32, 0.0  ;;  %v2168_v35 = vsel %vm782_vm3, 1.0, %v1724_v51  ;;  %v960_v13 = vrot.slane %v959_v25, 4  ;;  %v1122_v5 = vmul.f32 (!%p1402_p11), 0.0, %v2097_v58 }
 0x21b   : > { %v994_v36 = vadd.f32 %v993_v10, %v992_v33  ;;  %v995_v37 = vsel %vm928_vm2, %v2160_v0, 0.0  ;;  %v1034_v40 = vadd.f32 %v1033_v34, %v1032_v18  ;;  %v2174_v54 = vmul.f32 %v2168_v35, %v2039_v38 }
 0x21c   : > { %v1035_v60 = vsel %vm928_vm2, %v2168_v35, 0.0  ;;  %v961_v39 = vadd.f32 %v960_v13, %v959_v25  ;;  %v1123_v26 = vmul.f32 (!%p1402_p11), 0.0, %v2110_v17  ;;  %v1124_v2 = vmul.f32 (!%p1402_p11), 0.0, %v2126_v22 }
 0x21d   : > { %v996_v41 = vadd.f32 %v995_v37, %v994_v36  ;;  %v997_v42 = vsel %vm928_vm2, %v2174_v54, 0.0  ;;  %v1036_v51 = vadd.f32 %v1035_v60, %v1034_v40  ;;  %v1176_v16 = vmul.f32 (!%p1402_p11), 0.0, %v2088_v49 }
 0x21e   : > { %841 = vxpose.xlu0.b32.cont [11/16] (narrow) %v2110_v17, 8  ;;  %v962_v43 = vrot.slane %v961_v39, 2  ;;  %v1125_v8 = vmul.f32 (!%p1402_p11), 0.0, %v2135_v30  ;;  %v1146_v3 = vsel (!%p1402_p11), %vm928_vm2, %v1122_v5, 0.0  ;;  %v1148_v4 = vsel (!%p1402_p11), %vm928_vm2, %v1123_v26, 0.0 }
 0x21f   : > { %v998_v44 = vadd.f32 %v997_v42, %v996_v41  ;;  %v1037_v45 = vrot.slane %v1036_v51, 4  ;;  %v1147_v23 = vadd.f32 (!%p1402_p11), %v1146_v3, %v2105_v62  ;;  %v1126_v28 = vmul.f32 (!%p1402_p11), 0.0, %v2150_v32 }
 0x220   : > { %v963_v14 = vadd.f32 %v962_v43, %v961_v39  ;;  %v1150_v12 = vsel (!%p1402_p11), %vm928_vm2, %v1124_v2, 0.0  ;;  %v1177_v58 = vmul.f32 (!%p1402_p11), 0.0, %v2102_v11  ;;  %v1178_v17 = vmul.f32 (!%p1402_p11), 0.0, %v2117_v1 }
 0x221   : > { %v999_v38 = vrot.slane %v998_v44, 4  ;;  %v1038_v46 = vadd.f32 %v1037_v45, %v1036_v51  ;;  %v1149_v20 = vadd.f32 (!%p1402_p11), %v1148_v4, %v1147_v23  ;;  %v1200_v49 = vsel (!%p1402_p11), %vm928_vm2, %v1176_v16, 0.0 }
 0x222   : > { %842 = vxpose.xlu0.b32.cont [12/16] (narrow) %v2126_v22, 8  ;;  %v964_v59 = vrot.slane %v963_v14, 1  ;;  %v1179_v22 = vmul.f32 (!%p1402_p11), 0.0, %v2131_v24  ;;  %v1152_v15 = vsel (!%p1402_p11), %vm928_vm2, %v1125_v8, 0.0  ;;  %v1201_v25 = vadd.f32 (!%p1402_p11), %v1200_v49, %v2093_v56 }
 0x223   : > { %v1000_v47 = vadd.f32 %v999_v38, %v998_v44  ;;  %v1039_v7 = vrot.slane %v1038_v46, 2  ;;  %v1202_v62 = vsel (!%p1402_p11), %vm928_vm2, %v1177_v58, 0.0  ;;  %v1151_v6 = vadd.f32 (!%p1402_p11), %v1150_v12, %v1149_v20 }
 0x224   : > { %v965_v55 = vadd.f32 %v964_v59, %v963_v14  ;;  %v1180_v31 = vmul.f32 (!%p1402_p11), 0.0, %v2146_v61  ;;  %v1204_v11 = vsel (!%p1402_p11), %vm928_vm2, %v1178_v17, 0.0  ;;  %v1128_v1 = vmul.f32 (!%p1402_p11), 0.0, %v2174_v54 }
 0x225   : > { %v1001_v48 = vrot.slane %v1000_v47, 2  ;;  %v1040_v50 = vadd.f32 %v1039_v7, %v1038_v46  ;;  %v1154_v9 = vsel (!%p1402_p11), %vm928_vm2, %v1126_v28, 0.0  ;;  %v1203_v24 = vadd.f32 (!%p1402_p11), %v1202_v62, %v1201_v25 }
 0x226   : > { %843 = vxpose.xlu0.b32.cont [13/16] (narrow) %v2135_v30, 8  ;;  %967 = vst.msk [vmem:[%s2187_s17] sm:$0x1] %vm966_vm4, %v965_v55  ;;  %v1127_v30 = vmul.f32 (!%p1402_p11), 0.0, %v2160_v0  ;;  %v1181_v19 = vmul.f32 (!%p1402_p11), 0.0, %v2155_v27  ;;  %v1206_v33 = vsel (!%p1402_p11), %vm928_vm2, %v1179_v22, 0.0 }
 0x227   : > { %v1002_v52 = vadd.f32 %v1001_v48, %v1000_v47  ;;  %v1041_v53 = vrot.slane %v1040_v50, 1  ;;  %v1205_v56 = vadd.f32 (!%p1402_p11), %v1204_v11, %v1203_v24  ;;  %v1182_v34 = vmul.f32 (!%p1402_p11), 0.0, %v2168_v35 }
 0x228   : > { %v1156_v18 = vsel (!%p1402_p11), %vm928_vm2, %v1127_v30, 0.0  ;;  %v1208_v61 = vsel (!%p1402_p11), %vm928_vm2, %v1180_v31, 0.0  ;;  %v1158_v10 = vsel (!%p1402_p11), %vm928_vm2, %v1128_v1, 0.0  ;;  %v1210_v37 = vsel (!%p1402_p11), %vm928_vm2, %v1181_v19, 0.0 }
 0x229   : > { %v1003_v57 = vrot.slane %v1002_v52, 1  ;;  %v1042_v29 = vadd.f32 %v1041_v53, %v1040_v50  ;;  %v1207_v13 = vadd.f32 (!%p1402_p11), %v1206_v33, %v1205_v56  ;;  %v1212_v27 = vsel (!%p1402_p11), %vm928_vm2, %v1182_v34, 0.0 }
 0x22a   : > { %844 = vxpose.xlu0.b32.cont [14/16] (narrow) %v2150_v32, 8  ;;  %v1153_v32 = vadd.f32 (!%p1402_p11), %v1152_v15, %v1151_v6 }
 0x22b   : > { %v1004_v21 = vadd.f32 %v1003_v57, %v1002_v52  ;;  %1043 = vst.msk [vmem:[%s2187_s17 + $0x2] sm:$0x1] %vm966_vm4, %v1042_v29  ;;  %v1209_v40 = vadd.f32 (!%p1402_p11), %v1208_v61, %v1207_v13 }
 0x22d   : > { %1005 = vst.msk [vmem:[%s2187_s17 + $0x1] sm:$0x1] %vm966_vm4, %v1004_v21  ;;  %v1211_v60 = vadd.f32 (!%p1402_p11), %v1210_v37, %v1209_v40 }
 0x22e   : > { %845 = vxpose.xlu0.b32.cont [15/16] (narrow) %v2160_v0, 8  ;;  %v1155_v0 = vadd.f32 (!%p1402_p11), %v1154_v9, %v1153_v32 }
 0x22f   : > { %v1213_v41 = vadd.f32 (!%p1402_p11), %v1212_v27, %v1211_v60 }
 0x230   : > { %v1157_v36 = vadd.f32 (!%p1402_p11), %v1156_v18, %v1155_v0 }
 0x231   : > { %v1214_v51 = vrot.slane (!%p1402_p11), %v1213_v41, 4 }
 0x232   : > { %846 = vxpose.xlu0.b32.end [16/16] (narrow) %v2174_v54, 8  ;;  %v1159_v54 = vadd.f32 (!%p1402_p11), %v1158_v10, %v1157_v36 }
 0x233   : > { %v1215_v43 = vadd.f32 (!%p1402_p11), %v1214_v51, %v1213_v41 }
 0x234   : > { %v1160_v39 = vrot.slane (!%p1402_p11), %v1159_v54, 4 }
 0x235   : > { %v1216_v45 = vrot.slane (!%p1402_p11), %v1215_v43, 2 }
 0x236   : > { %v1161_v42 = vadd.f32 (!%p1402_p11), %v1160_v39, %v1159_v54 }
 0x237   : > { %v1217_v38 = vadd.f32 (!%p1402_p11), %v1216_v45, %v1215_v43 }
 0x238   : > { %v1162_v35 = vrot.slane (!%p1402_p11), %v1161_v42, 2 }
 0x239   : > { %v1218_v59 = vrot.slane (!%p1402_p11), %v1217_v38, 1 }
 0x23a   : > { %v1163_v44 = vadd.f32 (!%p1402_p11), %v1162_v35, %v1161_v42 }
 0x23b   : > { %v1219_v47 = vadd.f32 (!%p1402_p11), %v1218_v59, %v1217_v38 }
 0x23c   : > { %v1164_v14 = vrot.slane (!%p1402_p11), %v1163_v44, 1 }
 0x23d   : > { %1220 = vst.msk [vmem:[%s2187_s17 + $0x2] sm:$0x1] (!%p1402_p11), %vm966_vm4, %v1219_v47 }
 0x23e   : > { %v1165_v46 = vadd.f32 (!%p1402_p11), %v1164_v14, %v1163_v44 }
 0x240   : > { %1166 = vst.msk [vmem:[%s2187_s17 + $0x1] sm:$0x1] (!%p1402_p11), %vm966_vm4, %v1165_v46 }
 0x271   : > { %1047 = sbr.rel (%p1402_p11) target bundleno = 632 (0x278), region = 44 }
 0x276   : > { %v847_v63 = vpop.trf.xlu0 }
 0x277   : > { %863 = vst [vmem:[%s2198_s18] sm:$0xff] %v847_v63 }
 0x278 PF: > { %s1405_s19 = sshll.u32 %s1783_s25, 7  ;;  %s1240_s29 = sshll.u32 %s2198_s18, 4  ;;  %s1241_s29 = int_to_ptr.vmem [resolvable:$true] %s1240_s29 }
 0x279   : > { %s2242_s28 = scalar_lea.hbm %s2311_s5, %s1405_s19  ;;  %s1222_s9 = scalar_lea.sflag [#allocation3], %s2182_s15 }
 0x27a   : > { %s1628_s10 = scalar_lea.vmem %s1241_s29, 128  ;;  %s1725_s11 = smov [#allocation2]  }
 0x27b   : > { %p1629_p12 = scmp.ne.s32.totalorder %s1241_s29, %s1628_s10  ;;  %s1632_s12 = sshll.u32 %s1725_s11, 4  ;;  %s1633_s12 = int_to_ptr.vmem [resolvable:$false] %s1632_s12 }
 0x27c   : > { %s1634_s13 = scalar_lea.vmem %s1633_s12, 256  ;;  %p1635_p1 = scmp.lt.s32.totalorder %s1241_s29, %s1633_s12 }
 0x27d   : > { %p1630_p13 = pnand %p1629_p12, %p1800_p5  ;;  %p1636_p2 = scmp.lt.s32.totalorder %s1634_s13, %s1628_s10 }
 0x27f   : > { %p1631_p0 = pneg %p1630_p13  ;;  %p1637_p3 = por %p1636_p2, %p1635_p1 }
 0x281   : > { %p1638_p4 = pnand %p1637_p3, %p1631_p0 }
 0x283   : > { %1641 = shalt.err (!%p1638_p4)
}
 0x284   : > { %s1642_s14 = scalar_lea.hbm %s2242_s28, 128  ;;  %s1646_s20 = scalar_lea.hbm %s2311_s5, 256 }
 0x285   : > { %p1643_p7 = scmp.ne.s32.totalorder %s2242_s28, %s1642_s14  ;;  %p1647_p10 = scmp.lt.u32.totalorder %s2242_s28, %s2311_s5 }
 0x286   : > { %p1648_p11 = scmp.lt.u32.totalorder %s1646_s20, %s1642_s14  ;;  %p1650_p13 = scmp.lt.u32.totalorder %s1642_s14, %s2242_s28 }
 0x287   : > { %p1644_p8 = pnand %p1643_p7, %p1800_p5 }
 0x288   : > { %p1649_p12 = por %p1648_p11, %p1647_p10 }
 0x289   : > { %p1645_p9 = pneg %p1644_p8 }
 0x28a   : > { %p1651_p0 = por %p1650_p13, %p1649_p12 }
 0x28c   : > { %p1652_p1 = pnand %p1651_p0, %p1645_p9 }
 0x28e   : > { %1655 = shalt.err (!%p1652_p1)
}
 0x28f   : > { %1519 = dma.vmem_to_hbm [thread:$0]  (%p1800_p5), %s1241_s29, 128, %s2242_s28, %s1222_s9  }
 0x290   : > { %s2268_s13 = scalar_lea.hbm %s2312_s6, %s1405_s19  ;;  %s1253_s16 = sshll.u32 %s2187_s17, 4  ;;  %s1254_s16 = int_to_ptr.vmem [resolvable:$true] %s1253_s16 }
 0x291   : > { %s1227_s14 = scalar_lea.sflag [#allocation5], %s2182_s15  ;;  %s1656_s18 = scalar_lea.vmem %s1254_s16, 128 }
 0x292   : > { %p1657_p2 = scmp.ne.s32.totalorder %s1254_s16, %s1656_s18  ;;  %s1726_s20 = smov [#allocation4]  }
 0x293   : > { %s1660_s26 = sshll.u32 %s1726_s20, 4  ;;  %s1661_s26 = int_to_ptr.vmem [resolvable:$false] %s1660_s26 }
 0x294   : > { %p1658_p3 = pnand %p1657_p2, %p1800_p5  ;;  %s1662_s11 = scalar_lea.vmem %s1661_s26, 256 }
 0x295   : > { %p1663_p7 = scmp.lt.s32.totalorder %s1254_s16, %s1661_s26  ;;  %p1664_p8 = scmp.lt.s32.totalorder %s1662_s11, %s1656_s18 }
 0x296   : > { %p1659_p4 = pneg %p1658_p3 }
 0x297   : > { %p1665_p9 = por %p1664_p8, %p1663_p7 }
 0x299   : > { %p1666_p10 = pnand %p1665_p9, %p1659_p4 }
 0x29b   : > { %1669 = shalt.err (!%p1666_p10)
}
 0x29c   : > { %s1670_s25 = scalar_lea.hbm %s2268_s13, 128  ;;  %s1674_s19 = scalar_lea.hbm %s2312_s6, 256 }
 0x29d   : > { %p1671_p11 = scmp.ne.s32.totalorder %s2268_s13, %s1670_s25  ;;  %p1675_p0 = scmp.lt.u32.totalorder %s2268_s13, %s2312_s6 }
 0x29e   : > { %p1676_p1 = scmp.lt.u32.totalorder %s1674_s19, %s1670_s25  ;;  %p1678_p3 = scmp.lt.u32.totalorder %s1670_s25, %s2268_s13 }
 0x29f   : > { %p1672_p12 = pnand %p1671_p11, %p1800_p5 }
 0x2a0   : > { %p1677_p2 = por %p1676_p1, %p1675_p0 }
 0x2a1   : > { %p1673_p13 = pneg %p1672_p12 }
 0x2a2   : > { %p1679_p4 = por %p1678_p3, %p1677_p2 }
 0x2a4   : > { %p1680_p7 = pnand %p1679_p4, %p1673_p13 }
 0x2a6   : > { %1683 = shalt.err (!%p1680_p7)
}
 0x2a7   : > { %1520 = dma.vmem_to_hbm [thread:$0]  (%p1800_p5), %s1254_s16, 128, %s2268_s13, %s1227_s14  }
 0x2a8 PF: > { %p1530_p8 = scmp.ge.s32.totalorder %s1722_s24, 2  ;;  %s1265_s9 = sand.u32 1, %s1710_s21  }
 0x2a9   : > { %s1266_s10 = scalar_lea.sflag [#allocation3], %s1265_s9 }
 0x2aa   : > { %p1524_p9 = pnand %p1530_p8, %p1804_p6 }
 0x2ac   : > { %1701 = dma.done.wait (!%p1524_p9), %s1266_s10, 128  }
 0x2ad   : > { %1703 = vsyncadd (!%p1524_p9), %s1266_s10, 4294967168  ;;  %s1275_s12 = scalar_lea.sflag [#allocation5], %s1265_s9 }
 0x2ae   : > { %1705 = dma.done.wait (!%p1524_p9), %s1275_s12, 128  }
 0x2af   : > { %1707 = vsyncadd (!%p1524_p9), %s1275_s12, 4294967168  ;;  %p20_p5 = scmp.ge.s32.totalorder %s1787_s27, 4   ;;  %s2315_s21 = smov %s1714_s22 }
 0x2b0   : > { %s2316_s22 = smov %s1718_s23  ;;  %s2317_s23 = smov %s1798_s30 }
 0x2b1   : > { %s2318_s24 = smov %s1787_s27  ;;  %22 = sbr.rel (!%p20_p5) target bundleno = 5 (0x5), region = 96 }
 0x2b8   :  { %1280 = vsyncpa [#allocation3], 1 }
 0x2b9   :  { %1282 = vsyncpa [#allocation3 + $0x1], 1 }
 0x2ba   :  { %1283 = vsyncpa [#allocation5], 1 }
 0x2bb   :  { %1285 = vsyncpa [#allocation5 + $0x1], 1 }

</bundles_post_ra>
